<compile_context>
chip_gen: v5e
topology: v5e:2x2
jax: 0.10.0
libtpu: 0.0.40
codegen_flags: <defaults>
</compile_context>

<pallas_src>
import jax
import jax.numpy as jnp
from jax.experimental import pallas as pl
from jax.experimental.pallas import tpu as pltpu


def _mlp_kernel(x_ref, w1_ref, b1_ref, w2_ref, b2_ref, o_ref):
    # x: [TB, F] f32 | w1': [F, H] f32 | b1': [1, H] f32
    # w2: [H, O] f32 | b2: [1, O] f32  | o: [TB, O] f32
    h = jnp.dot(x_ref[...], w1_ref[...], preferred_element_type=jnp.float32)
    h = jnp.maximum(h + b1_ref[...], jnp.float32(0.0))
    o_ref[...] = (
        jnp.dot(h, w2_ref[...], preferred_element_type=jnp.float32) + b2_ref[...]
    )


def _fold_norm_into_first_linear(mn, mx, w1, b1):
    """Fold InputNorm's affine normalization into the first Linear (f32 math).

    xn @ W1 + b1 == x @ (W1 / scale[:, None]) + (b1 - (offset/scale + 1) @ W1)
    with offset/scale per the count > 0 branch of InputNorm.forward.
    """
    degenerate = mn == mx
    offset = jnp.where(degenerate, jnp.float32(-1.0), mn)
    scale = jnp.where(degenerate, jnp.float32(1.0), (mx - mn) * jnp.float32(0.5))
    inv = 1.0 / scale
    w1f = w1 * inv[:, None]                # [F, H], kept in f32 (precision)
    b1f = b1 - (offset * inv + 1.0) @ w1   # [H]
    return w1f, b1f


def _round_up(n, m):
    return ((n + m - 1) // m) * m


def _pick_batch_tile(B, tb_max):
    """Sublane-aligned batch tile; >= 2 grid steps when B > 8 (v7x megacore)."""
    if B <= 8:
        return _round_up(max(B, 1), 8)
    return max(8, min(tb_max, _round_up(pl.cdiv(B, 2), 8)))


def inputnorm_forward(x, count, mn, mx, w1, b1, w2, b2, *, tb_max=2048):
    """Pallas implementation of InputNorm.forward + wrapped MLP forward.

    `count` must be a concrete Python/numpy integer: the assert is gated
    outside any traced region, mirroring `assert self.count != 0`.
    """
    assert int(count) != 0, "InputNorm.forward asserts count != 0"

    # count > 0 branch: fold the normalization into W1/b1 (f32).  In a real
    # deployment this fold would be cached and recomputed only in update().
    w1f, b1f = _fold_norm_into_first_linear(
        mn.astype(jnp.float32), mx.astype(jnp.float32),
        w1.astype(jnp.float32), b1.astype(jnp.float32))

    B, F = x.shape
    H = w1.shape[1]
    O = w2.shape[1]

    TB = _pick_batch_tile(B, tb_max)
    grid = (pl.cdiv(B, TB),)               # ragged last block masked by Pallas

    xf = x.astype(jnp.float32)
    b1f = b1f.reshape(1, H)
    w2f = w2.astype(jnp.float32)
    b2r = b2.astype(jnp.float32).reshape(1, O)

    cost = pl.CostEstimate(
        flops=2 * B * F * H + 2 * B * H * O,
        transcendentals=0,
        bytes_accessed=4 * (B * F + F * H + H + H * O + O + B * O),
    )

    out = pl.pallas_call(
        _mlp_kernel,
        out_shape=jax.ShapeDtypeStruct((B, O), jnp.float32),  # exact shape, no slice
        grid=grid,
        in_specs=[
            pl.BlockSpec((TB, F), lambda i: (i, 0)),   # x    (tiled over batch)
            pl.BlockSpec((F, H), lambda i: (0, 0)),    # W1'  (VMEM-resident)
            pl.BlockSpec((1, H), lambda i: (0, 0)),    # b1'
            pl.BlockSpec((H, O), lambda i: (0, 0)),    # W2   (VMEM-resident)
            pl.BlockSpec((1, O), lambda i: (0, 0)),    # b2
        ],
        out_specs=pl.BlockSpec((TB, O), lambda i: (i, 0)),
        compiler_params=pltpu.CompilerParams(
            dimension_semantics=("parallel",),          # both TCs on v7x
        ),
        cost_estimate=cost,
    )(xf, w1f, b1f, w2f, b2r)

    # TODO(synk): `state` passthrough of the wrapped tianshou-style Net is not
    # modeled (the synthetic net is stateless); only the output tensor is returned.
    return out


def _reference(x, mn, mx, w1, b1, w2, b2):
    """Pure-JAX f32 reference matching the PyTorch module semantics."""
    degenerate = mn == mx
    offset = jnp.where(degenerate, -1.0, mn)
    scale = jnp.where(degenerate, 1.0, (mx - mn) / 2.0)
    xn = (x - offset[None, :]) / scale[None, :] - 1.0
    h = jnp.maximum(xn @ w1 + b1[None, :], 0.0)
    return h @ w2 + b2[None, :]


if __name__ == "__main__":
    # batch, in_features (== `shape`), hidden, output_dim.  B=24 with TB=16
    # exercises a multi-step grid plus a ragged (masked) final block.
    B, F, H, O = 24, 32, 64, 16

    key = jax.random.PRNGKey(0)
    kx, ku, kw1, kb1, kw2, kb2 = jax.random.split(key, 6)

    # Input batch.
    x = jax.random.normal(kx, (B, F), dtype=jnp.float32)

    # Simulate InputNorm.update() with a few observation batches to build the
    # running min/max buffers; force some features to be degenerate (min == max).
    obs = jax.random.normal(ku, (5, F), dtype=jnp.float32) * 2.0 + 0.5
    obs = obs.at[:, ::8].set(0.37)          # constant features -> min == max
    mn = jnp.min(obs, axis=0)
    mx = jnp.max(obs, axis=0)
    count = obs.shape[0]                    # Python int, count > 0

    # Deterministic synthetic parameters for the wrapped net.
    w1 = jax.random.normal(kw1, (F, H), dtype=jnp.float32) * (1.0 / jnp.sqrt(F))
    b1 = jax.random.normal(kb1, (H,), dtype=jnp.float32) * 0.01
    w2 = jax.random.normal(kw2, (H, O), dtype=jnp.float32) * (1.0 / jnp.sqrt(H))
    b2 = jax.random.normal(kb2, (O,), dtype=jnp.float32) * 0.01

    y = inputnorm_forward(x, count, mn, mx, w1, b1, w2, b2)
    y = jax.block_until_ready(y)

    # All-f32 math: only the fold's re-association separates us from the reference.
    y_ref = _reference(x, mn, mx, w1, b1, w2, b2)
    assert y.shape == y_ref.shape
    assert jnp.allclose(y, y_ref, atol=1e-3, rtol=1e-3), "mismatch vs reference"

    print("KERNEL_OK")
</pallas_src>

<mosaic_0001>
module attributes {stable_mosaic.version = 11 : i64} {
  func.func @_mlp_kernel(%arg0: i32, %arg1: memref<16x32xf32, #tpu.memory_space<vmem>>, %arg2: memref<32x64xf32, #tpu.memory_space<vmem>>, %arg3: memref<1x64xf32, #tpu.memory_space<vmem>>, %arg4: memref<64x16xf32, #tpu.memory_space<vmem>>, %arg5: memref<1x16xf32, #tpu.memory_space<vmem>>, %arg6: memref<16x16xf32, #tpu.memory_space<vmem>>) attributes {dimension_semantics = [#tpu.dimension_semantics<parallel>], iteration_bounds = array<i64: 2>, scalar_prefetch = 0 : i64, scratch_operands = 0 : i64, tpu.core_type = #tpu.core_type<tc>, window_params = [{transform_indices = @transform_0, window_bounds = array<i64: 16, 32>}, {pipeline_mode = #tpu.pipeline_mode<synchronous>, transform_indices = @transform_1, window_bounds = array<i64: 32, 64>}, {pipeline_mode = #tpu.pipeline_mode<synchronous>, transform_indices = @transform_2, window_bounds = array<i64: 1, 64>}, {pipeline_mode = #tpu.pipeline_mode<synchronous>, transform_indices = @transform_3, window_bounds = array<i64: 64, 16>}, {pipeline_mode = #tpu.pipeline_mode<synchronous>, transform_indices = @transform_4, window_bounds = array<i64: 1, 16>}, {transform_indices = @transform_5, window_bounds = array<i64: 16, 16>}]} {
    %c0 = arith.constant 0 : index
    %c0_0 = arith.constant 0 : index
    %0 = vector.load %arg1[%c0, %c0_0] : memref<16x32xf32, #tpu.memory_space<vmem>>, vector<16x32xf32>
    %c0_1 = arith.constant 0 : index
    %c0_2 = arith.constant 0 : index
    %1 = vector.load %arg2[%c0_1, %c0_2] : memref<32x64xf32, #tpu.memory_space<vmem>>, vector<32x64xf32>
    %cst = arith.constant dense<0.000000e+00> : vector<16x64xf32>
    %2 = tpu.matmul %0, %1, %cst {dimension_numbers = #tpu.dot_dimension_numbers<[1], [0], [0], [1], [0, 0, 1, 1], [], []>} : vector<16x32xf32>, vector<32x64xf32>, vector<16x64xf32> -> vector<16x64xf32>
    %c0_3 = arith.constant 0 : index
    %c0_4 = arith.constant 0 : index
    %3 = vector.load %arg3[%c0_3, %c0_4] : memref<1x64xf32, #tpu.memory_space<vmem>>, vector<1x64xf32>
    %4 = vector.broadcast %3 : vector<1x64xf32> to vector<16x64xf32>
    %5 = arith.addf %2, %4 : vector<16x64xf32>
    %cst_5 = arith.constant 0.000000e+00 : f32
    %6 = vector.broadcast %cst_5 : f32 to vector<16x64xf32>
    %7 = arith.maximumf %5, %6 : vector<16x64xf32>
    %c0_6 = arith.constant 0 : index
    %c0_7 = arith.constant 0 : index
    %8 = vector.load %arg4[%c0_6, %c0_7] : memref<64x16xf32, #tpu.memory_space<vmem>>, vector<64x16xf32>
    %cst_8 = arith.constant dense<0.000000e+00> : vector<16x16xf32>
    %9 = tpu.matmul %7, %8, %cst_8 {dimension_numbers = #tpu.dot_dimension_numbers<[1], [0], [0], [1], [0, 0, 1, 1], [], []>} : vector<16x64xf32>, vector<64x16xf32>, vector<16x16xf32> -> vector<16x16xf32>
    %c0_9 = arith.constant 0 : index
    %c0_10 = arith.constant 0 : index
    %10 = vector.load %arg5[%c0_9, %c0_10] : memref<1x16xf32, #tpu.memory_space<vmem>>, vector<1x16xf32>
    %11 = vector.broadcast %10 : vector<1x16xf32> to vector<16x16xf32>
    %12 = arith.addf %9, %11 : vector<16x16xf32>
    %c0_11 = arith.constant 0 : index
    %c0_12 = arith.constant 0 : index
    %13 = vector.load %arg6[%c0_11, %c0_12] : memref<16x16xf32, #tpu.memory_space<vmem>>, vector<16x16xf32>
    tpu.vector_store %arg6[%c0_11, %c0_12], %12 {strides = array<i32>} : memref<16x16xf32, #tpu.memory_space<vmem>>, vector<16x16xf32>,
    return
  }
  func.func @transform_0(%arg0: i32) -> (i32, i32) {
    %c0_i32 = arith.constant 0 : i32
    %c0_i32_0 = arith.constant 0 : i32
    return %arg0, %c0_i32 : i32, i32
  }
  func.func @transform_1(%arg0: i32) -> (i32, i32) {
    %c0_i32 = arith.constant 0 : i32
    %c0_i32_0 = arith.constant 0 : i32
    %c0_i32_1 = arith.constant 0 : i32
    return %c0_i32, %c0_i32_0 : i32, i32
  }
  func.func @transform_2(%arg0: i32) -> (i32, i32) {
    %c0_i32 = arith.constant 0 : i32
    %c0_i32_0 = arith.constant 0 : i32
    %c0_i32_1 = arith.constant 0 : i32
    return %c0_i32, %c0_i32_0 : i32, i32
  }
  func.func @transform_3(%arg0: i32) -> (i32, i32) {
    %c0_i32 = arith.constant 0 : i32
    %c0_i32_0 = arith.constant 0 : i32
    %c0_i32_1 = arith.constant 0 : i32
    return %c0_i32, %c0_i32_0 : i32, i32
  }
  func.func @transform_4(%arg0: i32) -> (i32, i32) {
    %c0_i32 = arith.constant 0 : i32
    %c0_i32_0 = arith.constant 0 : i32
    %c0_i32_1 = arith.constant 0 : i32
    return %c0_i32, %c0_i32_0 : i32, i32
  }
  func.func @transform_5(%arg0: i32) -> (i32, i32) {
    %c0_i32 = arith.constant 0 : i32
    %c0_i32_0 = arith.constant 0 : i32
    return %arg0, %c0_i32 : i32, i32
  }
}

</mosaic_0001>

<bundles_post_ra>
// kernel: tpu_custom_call.1
= control target key start
LH: loop header
LB: loop body
LE: loop exit
PB: predicated region body
PF: predicated region fallthrough
CT: control target
= control target key end

     0   :  { %s804_s18 = smov 0   ;;  %s806_s19 = smov 0   ;;  %s929_s0 = inlined_call_operand.vmem [shape: f32[24,32], index: 0, kind: input, shape index: {}]   ;;  %s930_s1 = inlined_call_operand.vmem [shape: f32[32,64], index: 1, kind: input, shape index: {}]   ;;  %s931_s2 = inlined_call_operand.vmem [shape: f32[1,64], index: 2, kind: input, shape index: {}]   ;;  %s932_s3 = inlined_call_operand.vmem [shape: f32[64,16], index: 3, kind: input, shape index: {}]   ;;  %s933_s4 = inlined_call_operand.vmem [shape: f32[1,16], index: 4, kind: input, shape index: {}]   ;;  %s934_s5 = inlined_call_operand.vmem [shape: f32[24,16], index: 5, kind: output, shape index: {}]  }
   0x1   :  { %s808_s20 = smov 0  }
   0x2 LB: > { %s817_s21 = sadd.s32 4294967295, %s740_s20   ;;  %s819_s22 = sadd.s32 1, %s740_s20   ;;  %s740_s20 = sphi %s808_s20, %s938_s20   ;;  %s736_s19 = sphi %s806_s19, %s937_s19   ;;  %s732_s18 = sphi %s804_s18, %s936_s18  }
   0x3   : > { %s129_s23 = ssub.s32 %s740_s20, %s819_s22  ;;  %s132_s24 = sadd.s32 1, %s736_s19 }
   0x4   : > { %p130_p0 = scmp.eq.s32.totalorder %s129_s23, 0  ;;  %p142_p1 = scmp.ne.s32.totalorder %s736_s19, %s732_s18 }
   0x5   : > { %p143_p2 = scmp.eq.s32.totalorder %s817_s21, 1  ;;  %p556_p3 = scmp.ge.s32.totalorder %s740_s20, 1 }
   0x6   : > { %s827_s25 = scalar_select %p130_p0, %s736_s19, %s132_s24  }
   0x7   : > { %p829_p4 = por %p143_p2, %p142_p1  ;;  %p196_p5 = scmp.lt.s32.totalorder %s740_s20, 3 }
   0x9   : > { %p197_p6 = pnand %p556_p3, %p196_p5 }
   0xa   : > { %s840_s6 = sshll.u32 (!%p197_p6), %s817_s21, 1  ;;  %s224_s16 = sand.u32 (!%p197_p6), 1, %s732_s18  }
   0xb   : > { %200 = sbr.rel (%p197_p6) target bundleno = 334 (0x14e), region = 40  ;;  %p232_p7 = scmp.lt.s32.totalorder (!%p197_p6), %s840_s6, 2 }
   0xc   : > { %s557_s17 = sshll.u32 (!%p197_p6), %s224_s16, 4 }
   0xd   : > { %s884_s24 = scalar_lea.vmem (!%p197_p6), [#allocation2], %s557_s17  }
  0x10   : > { %v251_v0 = vld [vmem:[%s930_s1 + $0x18] sm:$0xff]  ;;  %v250_v1 = vld [vmem:[%s930_s1 + $0x10] sm:$0xff]  ;;  %v249_v4 = vld [vmem:[%s930_s1 + $0x8] sm:$0xff]  ;;  %s233_s13 = scalar_select %p232_p7, %s840_s6, 2  ;;  %vm256_vm0 = vcmask 261120   ;;  %vm300_vm1 = vcmask 523264  }
  0x11   : > { %584 = vmatpush.msra.mxu3 %v251_v0  ;;  %275 = vmatpush.msra.mxu0 %v251_v0  ;;  %v295_v2 = vld [vmem:[%s932_s3 + $0x38] sm:$0xff]  ;;  %v294_v3 = vld [vmem:[%s932_s3 + $0x30] sm:$0xff]  ;;  %v293_v5 = vld [vmem:[%s932_s3 + $0x28] sm:$0xff]  ;;  %vm330_vm2 = vcmask 130048   ;;  %s341_s18 = ssub.s32 (%p829_p4), 3, %s840_s6 }
  0x12   : > { %588 = vmatpush.msra.mxu2 %v295_v2  ;;  %315 = vmatpush.msra.mxu1 %v295_v2  ;;  %v248_v6 = vld [vmem:[%s930_s1] sm:$0xff]  ;;  %s559_s20 = sshll.u32 %s233_s13, 3  ;;  %v291_v10 = vld [vmem:[%s932_s3 + $0x18] sm:$0xff]  ;;  %v290_v11 = vld [vmem:[%s932_s3 + $0x10] sm:$0xff]  ;;  %p342_p8 = scmp.lt.s32.totalorder (%p829_p4), %s341_s18, 2 }
  0x13   : > { %585 = vmatpush.msra.mxu3 %v250_v1  ;;  %276 = vmatpush.msra.mxu0 %v250_v1  ;;  %s235_s27 = scalar_lea.vmem %s929_s0, %s559_s20  ;;  %v292_v7 = vld [vmem:[%s932_s3 + $0x20] sm:$0xff]  ;;  %v289_v12 = vld [vmem:[%s932_s3 + $0x8] sm:$0xff] }
  0x14   : > { %589 = vmatpush.msra.mxu2 %v294_v3  ;;  %316 = vmatpush.msra.mxu1 %v294_v3  ;;  %v247_v8 = vld [vmem:[%s235_s27 + $0x8] sm:$0xff]  ;;  %v246_v9 = vld [vmem:[%s235_s27] sm:$0xff]  ;;  %s581_s27 = sshll.u32 (%p829_p4), %s817_s21, 4 }
  0x15   : > { %586 = vmatpush.msra.mxu3 %v249_v4  ;;  %277 = vmatpush.msra.mxu0 %v249_v4  ;;  %v288_v13 = vld [vmem:[%s932_s3] sm:$0xff]  ;;  %s895_s30 = scalar_lea.vmem (%p829_p4), %s934_s5, %s581_s27  }
  0x16   : > { %590 = vmatpush.msra.mxu2 %v293_v5  ;;  %317 = vmatpush.msra.mxu1 %v293_v5  ;;  %v684_v14 = vld [vmem:[%s931_s2] ss:$0 sm:$0xff] }
  0x17   : > { %587 = vmatpush.msra.mxu3 %v248_v6  ;;  %278 = vmatpush.msra.mxu0 %v248_v6  ;;  %v685_v21 = vld [vmem:[%s933_s4] ss:$0 sm:$0xff] }
  0x18   : > { %561 = vmatmul.msk.f32.vlgmr.msra.gmra.mxu3 %vm256_vm0, %v247_v8  ;;  %560 = vmatmul.msk.f32.vlgmr.msra.gmra.mxu0 %vm256_vm0, %v246_v9 }
  0x19   : > { %591 = vmatpush.msra.mxu2 %v292_v7  ;;  %318 = vmatpush.msra.mxu1 %v292_v7 }
  0x1b   : > { %592 = vmatpush.msra.mxu2 %v291_v10  ;;  %319 = vmatpush.msra.mxu1 %v291_v10 }
  0x1d   : > { %593 = vmatpush.msra.mxu2 %v290_v11  ;;  %320 = vmatpush.msra.mxu1 %v290_v11 }
  0x1f   : > { %594 = vmatpush.msra.mxu2 %v289_v12  ;;  %321 = vmatpush.msra.mxu1 %v289_v12 }
  0x21   : > { %595 = vmatpush.msra.mxu2 %v288_v13  ;;  %322 = vmatpush.msra.mxu1 %v288_v13 }
  0x95   : > { %v280_v15 = vpop.f32.mrf.mxu0 }
  0x96   : > { %v281_v16 = vadd.f32 %v684_v14, %v280_v15 }
  0x98   : > { %v286_v17 = vmax.f32 %v281_v16, 0.0 }
  0x9a   : > { %562 = vmatmul.msk.f32.vlgmr.msra.gmra.mxu1 %vm300_vm1, %v286_v17 }
  0x9b   : > { %v283_v18 = vpop.f32.mrf.mxu3 }
  0x9c   : > { %v284_v19 = vadd.f32 %v684_v14, %v283_v18 }
  0x9e   : > { %v287_v20 = vmax.f32 %v284_v19, 0.0 }
  0xa0   : > { %563 = vmatmul.msk.f32.vlgmr.msra.gmra.mxu2 %vm300_vm1, %v287_v20 }
 0x117   : > { %v324_v22 = vpop.f32.mrf.mxu1 }
 0x118   : > { %v325_v23 = vadd.f32 %v685_v21, %v324_v22 }
 0x11a   : > { %331 = vst.msk [vmem:[%s884_s24] sm:$0xff] %vm330_vm2, %v325_v23 }
 0x122   : > { %339 = sbr.rel (!%p829_p4) target bundleno = 334 (0x14e), region = 44 }
 0x123   : > { %v327_v24 = vpop.f32.mrf.mxu2 }
 0x124   : > { %v328_v25 = vadd.f32 %v685_v21, %v327_v24 }
 0x126   : > { %332 = vst.msk [vmem:[%s884_s24 + $0x8] sm:$0xff] %vm330_vm2, %v328_v25 }
 0x127   : > { %s940_s18 = smov (!%p342_p8, %s341_s18), 2 }
 0x128   : > { %s566_s7 = sshll.u32 %s940_s18, 3 }
 0x129   : > { %p569_p9 = scmp.eq.s32.totalorder %s566_s7, 0 }
 0x12a   : > { %s901_s8 = sshrl.u32 (!%p569_p9), %s940_s18, 1 }
 0x12b   : > { %350 = sbr.rel (%p569_p9) target bundleno = 334 (0x14e), region = 48  ;;  %p570_p10 = scmp.le.s32.totalorder (!%p569_p9), %s901_s8, 0 }
 0x130   : > { %509 = sbr.rel (%p570_p10) target bundleno = 317 (0x13d), region = 124  ;;  %s742_s21 = smov (!%p570_p10), %s895_s30  }
 0x131   : > { %s746_s26 = smov (!%p570_p10), %s884_s24   ;;  %s750_s6 = smov (!%p570_p10), 0  }
 0x132   : > { %s754_s9 = smov (!%p570_p10), 0  }
 0x135 LB: >> { %v415_v26 = vld [vmem:[%s748_s26] sm:$0xff]  ;;  %v417_v27 = vld [vmem:[%s748_s26 + $0x8] sm:$0xff]  ;;  %s419_s10 = sadd.s32 1, %s752_s6  ;;  %s409_s9 = sadd.s32 1, %s756_s9   ;;  %s756_s9 = sphi %s754_s9, %s409_s9   ;;  %s752_s6 = sphi %s750_s6, %s751_s6   ;;  %s748_s26 = sphi %s746_s26, %s424_s26   ;;  %s744_s21 = sphi %s742_s21, %s425_s21  }
 0x136   : >> { %416 = vst [vmem:[%s744_s21] sm:$0xff] %v415_v26  ;;  %p420_p11 = scmp.ge.s32.totalorder %s419_s10, %s901_s8  ;;  %p408_p12 = scmp.ge.s32.totalorder %s409_s9, %s901_s8 }
 0x137   : >> { %418 = vst [vmem:[%s744_s21 + $0x8] sm:$0xff] %v417_v27 }
 0x138   : >> { %s942_s10 = smov (%p420_p11, %s419_s10), 0  ;;  %411 = sbr.rel (!%p408_p12) target bundleno = 309 (0x135), region = 130 }
 0x139   : >> { %s571_s11 = sshll.u32 %s942_s10, 4  ;;  %s751_s6 = smov %s942_s10  }
 0x13a   : >> { %s424_s26 = scalar_lea.vmem %s884_s24, %s571_s11 [#allocation2]   ;;  %s425_s21 = scalar_lea.vmem %s895_s30, %s571_s11  }
 0x13d PF: > { %s911_s12 = sand.u32 1, %s940_s18   ;;  %s582_s13 = sshll.u32 %s901_s8, 4 }
 0x13e   : > { %s430_s14 = scalar_lea.vmem %s884_s24, %s582_s13 [#allocation2]   ;;  %s432_s15 = scalar_lea.vmem %s895_s30, %s582_s13  }
 0x13f   : > { %p576_p13 = scmp.le.s32.totalorder %s911_s12, 0 }
 0x140   : > { %s758_s16 = smov (!%p576_p13), %s432_s15   ;;  %s762_s17 = smov (!%p576_p13), %s430_s14  }
 0x141   : > { %523 = sbr.rel (%p576_p13) target bundleno = 334 (0x14e), region = 135  ;;  %s766_s20 = smov (!%p576_p13), 0  }
 0x142   : > { %s770_s23 = smov (!%p576_p13), 0  }
 0x146 LB: >> { %v442_v28 = vld [vmem:[%s764_s17] sm:$0xff]  ;;  %s444_s18 = sadd.s32 1, %s768_s20  ;;  %s436_s23 = sadd.s32 1, %s772_s23   ;;  %s772_s23 = sphi %s770_s23, %s436_s23   ;;  %s768_s20 = sphi %s766_s20, %s767_s20   ;;  %s764_s17 = sphi %s762_s17, %s449_s17   ;;  %s760_s16 = sphi %s758_s16, %s450_s16  }
 0x147   : >> { %443 = vst [vmem:[%s760_s16] sm:$0xff] %v442_v28  ;;  %p445_p0 = scmp.ge.s32.totalorder %s444_s18, %s911_s12  ;;  %p435_p1 = scmp.ge.s32.totalorder %s436_s23, %s911_s12 }
 0x149   : >> { %s944_s18 = smov (%p445_p0, %s444_s18), 0  ;;  %438 = sbr.rel (!%p435_p1) target bundleno = 326 (0x146), region = 141 }
 0x14a   : >> { %s577_s24 = sshll.u32 %s944_s18, 3  ;;  %s767_s20 = smov %s944_s18  }
 0x14b   : >> { %s449_s17 = scalar_lea.vmem %s430_s14, %s577_s24 [#allocation2]   ;;  %s450_s16 = scalar_lea.vmem %s432_s15, %s577_s24  }
 0x14e PF: > { %p12_p2 = scmp.ge.s32.totalorder %s819_s22, 4   ;;  %s936_s18 = smov %s736_s19 }
 0x14f   : > { %s937_s19 = smov %s827_s25  ;;  %s938_s20 = smov %s819_s22 }
 0x150   :  { %14 = sbr.rel (!%p12_p2) target bundleno = 2 (0x2), region = 152 }

</bundles_post_ra>
